<compile_context>
chip_gen: v5e
topology: v5e:2x2
jax: 0.10.0
libtpu: 0.0.40
codegen_flags: <defaults>
</compile_context>

<pallas_src>
import functools

import jax
import jax.numpy as jnp
from jax.experimental import pallas as pl
from jax.experimental.pallas import tpu as pltpu

LANE = 128                              # TPU lane width (feature dims pad to this)
_EPS = 1e-12                            # F.normalize eps
_VMEM_LIMIT = 32 * 1024 * 1024          # safe on v5e / v6e / v7x (<= per-TC physical)


def _round_up(v, m):
    return ((v + m - 1) // m) * m


def _pad2d(x, rows, cols):
    r, c = x.shape
    return jnp.pad(x, ((0, rows - r), (0, cols - c)))


# --------------------------------------------------------------------------- #
# Fully-fused small-graph kernel: both GraphConv layers + dim-0 L2 normalize
# in one pallas_call, everything resident in VMEM.
# --------------------------------------------------------------------------- #
def _gcn_fused_kernel(a_ref, x_ref, w1_ref, b1_ref, w2_ref, b2_ref, o_ref, *,
                      n_valid):
    a = a_ref[...]
    xw = jnp.dot(x_ref[...], w1_ref[...], preferred_element_type=jnp.float32)
    h1 = jnp.maximum(jnp.dot(a, xw, preferred_element_type=jnp.float32)
                     + b1_ref[...], 0.0)
    # nn.Dropout(0.5): eval-mode identity.
    hw = jnp.dot(h1, w2_ref[...], preferred_element_type=jnp.float32)
    h2 = jnp.dot(a, hw, preferred_element_type=jnp.float32) + b2_ref[...]

    # F.normalize(p=2, dim=0) with padded rows masked out of the norm.
    rows = jax.lax.broadcasted_iota(jnp.int32, h2.shape, 0)
    h2m = jnp.where(rows < n_valid, h2, 0.0)
    ss = jnp.sum(h2m * h2m, axis=0, keepdims=True)
    inv = jax.lax.rsqrt(jnp.maximum(ss, _EPS * _EPS))
    o_ref[...] = (h2 * inv).astype(o_ref.dtype)


# --------------------------------------------------------------------------- #
# Streamed aggregation kernel with fused feature transform:
#   out_tile = act( (sum_k Ahat[i,k] @ F[k]) @ W + bias )
# Ahat is streamed in (tm, tk) tiles (grid axes: row tiles 'parallel',
# K tiles 'arbitrary', innermost).  W and bias are VMEM-resident; the feature
# operand is either fully resident (sliced by K inside the kernel) or streamed
# as a (tk, f_in) tile.
# --------------------------------------------------------------------------- #
def _agg_kernel(a_ref, f_ref, w_ref, bias_ref, o_ref, acc_ref, *,
                apply_relu, tk, feat_resident):
    k = pl.program_id(1)

    @pl.when(k == 0)
    def _():
        acc_ref[...] = jnp.zeros_like(acc_ref)

    if feat_resident:
        start = pl.multiple_of(k * tk, tk)
        f_tile = f_ref[pl.ds(start, tk), :]
    else:
        f_tile = f_ref[...]

    acc_ref[...] += jnp.dot(a_ref[...], f_tile,
                            preferred_element_type=jnp.float32)

    @pl.when(k == pl.num_programs(1) - 1)
    def _():
        r = jnp.dot(acc_ref[...], w_ref[...],
                    preferred_element_type=jnp.float32) + bias_ref[...]
        if apply_relu:
            r = jnp.maximum(r, 0.0)
        o_ref[...] = r.astype(o_ref.dtype)


def _aggregate(a_p, feat, w, bias, *, apply_relu, tm, tk, feat_resident,
               out_dtype):
    n_p = a_p.shape[0]
    f_in = feat.shape[1]
    f_out = w.shape[1]
    grid = (n_p // tm, n_p // tk)

    if feat_resident:
        feat_spec = pl.BlockSpec((n_p, f_in), lambda i, kk: (0, 0))
    else:
        feat_spec = pl.BlockSpec((tk, f_in), lambda i, kk: (kk, 0))

    return pl.pallas_call(
        functools.partial(_agg_kernel, apply_relu=apply_relu, tk=tk,
                          feat_resident=feat_resident),
        out_shape=jax.ShapeDtypeStruct((n_p, f_out), out_dtype),
        grid=grid,
        in_specs=[
            pl.BlockSpec((tm, tk), lambda i, kk: (i, kk)),      # Ahat (streamed)
            feat_spec,                                          # features
            pl.BlockSpec((f_in, f_out), lambda i, kk: (0, 0)),  # W (resident)
            pl.BlockSpec((1, f_out), lambda i, kk: (0, 0)),     # bias (resident)
        ],
        out_specs=pl.BlockSpec((tm, f_out), lambda i, kk: (i, 0)),
        scratch_shapes=[pltpu.VMEM((tm, f_in), jnp.float32)],
        compiler_params=pltpu.CompilerParams(
            dimension_semantics=("parallel", "arbitrary"),
            vmem_limit_bytes=_VMEM_LIMIT,
        ),
    )(a_p, feat, w, bias)


# --------------------------------------------------------------------------- #
# Column sum-of-squares over nodes (accumulated across row tiles), masking the
# padded rows so they do not pollute the dim-0 L2 norm.
# --------------------------------------------------------------------------- #
def _col_sumsq_kernel(h_ref, o_ref, *, tm, n_valid):
    i = pl.program_id(0)

    @pl.when(i == 0)
    def _():
        o_ref[...] = jnp.zeros_like(o_ref)

    h = h_ref[...].astype(jnp.float32)
    rows = jax.lax.broadcasted_iota(jnp.int32, h.shape, 0) + i * tm
    h = jnp.where(rows < n_valid, h, 0.0)
    o_ref[...] += jnp.sum(h * h, axis=0, keepdims=True)


def _col_sumsq(h, *, n_valid, tm):
    m, f = h.shape
    return pl.pallas_call(
        functools.partial(_col_sumsq_kernel, tm=tm, n_valid=n_valid),
        out_shape=jax.ShapeDtypeStruct((1, f), jnp.float32),
        grid=(m // tm,),
        in_specs=[pl.BlockSpec((tm, f), lambda i: (i, 0))],
        out_specs=pl.BlockSpec((1, f), lambda i: (0, 0)),
        compiler_params=pltpu.CompilerParams(
            dimension_semantics=("arbitrary",),
            vmem_limit_bytes=_VMEM_LIMIT,
        ),
    )(h)


# --------------------------------------------------------------------------- #
# Finalize the column L2 normalization: out = h * rsqrt(max(sumsq, eps^2)).
# --------------------------------------------------------------------------- #
def _l2_scale_kernel(h_ref, ss_ref, o_ref):
    inv = jax.lax.rsqrt(jnp.maximum(ss_ref[...], _EPS * _EPS))
    o_ref[...] = (h_ref[...] * inv).astype(o_ref.dtype)


def _l2_scale(h, ss, *, tm):
    m, f = h.shape
    return pl.pallas_call(
        _l2_scale_kernel,
        out_shape=jax.ShapeDtypeStruct((m, f), jnp.float32),
        grid=(m // tm,),
        in_specs=[pl.BlockSpec((tm, f), lambda i: (i, 0)),
                  pl.BlockSpec((1, f), lambda i: (0, 0))],
        out_specs=pl.BlockSpec((tm, f), lambda i: (i, 0)),
        compiler_params=pltpu.CompilerParams(
            dimension_semantics=("parallel",),
            vmem_limit_bytes=_VMEM_LIMIT,
        ),
    )(h, ss)


# --------------------------------------------------------------------------- #
# Full GCN forward.
# --------------------------------------------------------------------------- #
def gcn_forward(a_hat, x, w1, b1, w2, b2, *, tile_agg=512,
                matmul_dtype=jnp.float32, allow_fused=True,
                feat_resident=None, fused_vmem_budget_bytes=12 * 1024 * 1024):
    """GCN forward (eval mode).

    matmul_dtype=jnp.bfloat16 halves the dominant N^2 Ahat stream and uses the
    native bf16 MXU path (f32 accumulation kept); default stays f32 so the
    1e-4 reference tolerance holds.
    """
    n = x.shape[0]
    in_f, hid = w1.shape
    out_f = w2.shape[1]

    in_p = _round_up(in_f, LANE)
    hid_p = _round_up(hid, LANE)
    out_p = _round_up(out_f, LANE)

    # Weights/biases are small; keep them f32 and zero-pad to lane width.
    w1_p = _pad2d(w1.astype(jnp.float32), in_p, hid_p)
    b1_p = _pad2d(b1.reshape(1, -1).astype(jnp.float32), 1, hid_p)
    w2_p = _pad2d(w2.astype(jnp.float32), hid_p, out_p)
    b2_p = _pad2d(b2.reshape(1, -1).astype(jnp.float32), 1, out_p)

    # ---------- small-graph path: whole GCN fused into one pallas_call ----------
    n_small = _round_up(n, LANE)
    fused_bytes = 4 * (n_small * n_small
                       + n_small * (in_p + hid_p + 2 * out_p)
                       + in_p * hid_p + hid_p * out_p)
    if allow_fused and fused_bytes <= fused_vmem_budget_bytes:
        n_p = n_small
        a_p = a_hat if (a_hat.shape == (n_p, n_p) and a_hat.dtype == jnp.float32) \
            else _pad2d(a_hat.astype(jnp.float32), n_p, n_p)
        x_p = _pad2d(x.astype(jnp.float32), n_p, in_p)
        out_full = pl.pallas_call(
            functools.partial(_gcn_fused_kernel, n_valid=n),
            out_shape=jax.ShapeDtypeStruct((n_p, out_p), jnp.float32),
            compiler_params=pltpu.CompilerParams(vmem_limit_bytes=_VMEM_LIMIT),
        )(a_p, x_p, w1_p, b1_p, w2_p, b2_p)
        return out_full[:n, :out_f]

    # ---------- streamed path: tiled aggregation with fused feature transform ----
    md = matmul_dtype
    tile_agg = max(LANE, tile_agg)
    n_p = _round_up(n, tile_agg)

    # TODO(synk): for repeated calls on a static graph, pre-pad/cast Ahat once
    # outside this function — the check below accepts a pre-padded Ahat as-is.
    a_p = a_hat if (a_hat.shape == (n_p, n_p) and a_hat.dtype == md) \
        else _pad2d(a_hat.astype(md), n_p, n_p)
    x_p = _pad2d(x.astype(md), n_p, in_p)

    if feat_resident is None:
        # Keep the feature operand fully VMEM-resident only while its
        # (double-buffered) footprint stays well under v7x's 64 MiB/TC budget.
        feat_resident = (2 * n_p * max(in_p, hid_p)
                         * jnp.dtype(md).itemsize) <= 8 * 1024 * 1024

    # Layer 1: h1 = relu((Ahat @ X) @ W1 + b1)  (== relu(Ahat @ (X @ W1) + b1))
    h1 = _aggregate(a_p, x_p, w1_p, b1_p, apply_relu=True,
                    tm=tile_agg, tk=tile_agg, feat_resident=feat_resident,
                    out_dtype=md)
    # nn.Dropout(0.5): eval-mode identity.
    # Layer 2: h2 = (Ahat @ h1) @ W2 + b2
    h2 = _aggregate(a_p, h1, w2_p, b2_p, apply_relu=False,
                    tm=tile_agg, tk=tile_agg, feat_resident=feat_resident,
                    out_dtype=jnp.float32)

    # F.normalize(p=2, dim=0): accumulate column sumsq (padded rows masked),
    # then rsqrt-scale.
    ss = _col_sumsq(h2, n_valid=n, tm=tile_agg)
    out_full = _l2_scale(h2, ss, tm=tile_agg)
    return out_full[:n, :out_f]


def build_normalized_adjacency(key, n, p=0.15):
    """Random symmetric graph, dense Ahat = D^-1/2 A D^-1/2 (deg clamped to >=1)."""
    u = jax.random.uniform(key, (n, n))
    upper = jnp.triu((u < p).astype(jnp.float32), k=1)
    a = upper + upper.T                               # symmetric, no self-loops
    deg = jnp.maximum(jnp.sum(a, axis=1), 1.0)        # dgl clamps degrees to >= 1
    d_inv_sqrt = 1.0 / jnp.sqrt(deg)
    return (a * d_inv_sqrt[:, None] * d_inv_sqrt[None, :]).astype(jnp.float32)


def _reference(a_hat, x, w1, b1, w2, b2):
    with jax.default_matmul_precision("float32"):
        h1 = jnp.maximum(a_hat @ (x @ w1) + b1, 0.0)
        h2 = a_hat @ (h1 @ w2) + b2
    return h2 / jnp.maximum(
        jnp.sqrt(jnp.sum(h2 * h2, axis=0, keepdims=True)), _EPS)


if __name__ == "__main__":
    key = jax.random.PRNGKey(0)
    k_adj, k_x, k_w1, k_w2, k_adj2, k_x2 = jax.random.split(key, 6)

    IN_SIZE, HID_SIZE, OUT_SIZE = 16, 32, 8

    # Deterministic Xavier-uniform-style init (matches dgl.GraphConv shapes).
    lim1 = (6.0 / (IN_SIZE + HID_SIZE)) ** 0.5
    w1 = jax.random.uniform(k_w1, (IN_SIZE, HID_SIZE), minval=-lim1, maxval=lim1,
                            dtype=jnp.float32)
    b1 = jnp.zeros((1, HID_SIZE), jnp.float32)
    lim2 = (6.0 / (HID_SIZE + OUT_SIZE)) ** 0.5
    w2 = jax.random.uniform(k_w2, (HID_SIZE, OUT_SIZE), minval=-lim2, maxval=lim2,
                            dtype=jnp.float32)
    b2 = jnp.zeros((1, OUT_SIZE), jnp.float32)

    # ---- Test 1: demo-sized graph -> fully fused single-kernel path ----
    N = 64
    a_hat = build_normalized_adjacency(k_adj, N)
    x = jax.random.normal(k_x, (N, IN_SIZE), dtype=jnp.float32)
    out = jax.block_until_ready(gcn_forward(a_hat, x, w1, b1, w2, b2))
    ref = _reference(a_hat, x, w1, b1, w2, b2)
    assert out.shape == (N, OUT_SIZE)
    assert jnp.allclose(out, ref, atol=1e-4, rtol=1e-4), \
        float(jnp.max(jnp.abs(out - ref)))

    # ---- Test 2: larger graph -> streamed tiled aggregation path ----
    # (n=600 pads to 1024 with 512-tiles: exercises multi-tile grid, padded-row
    #  masking, and both the resident and streamed feature-operand branches.)
    N2 = 600
    a_hat2 = build_normalized_adjacency(k_adj2, N2)
    x2 = jax.random.normal(k_x2, (N2, IN_SIZE), dtype=jnp.float32)
    ref2 = _reference(a_hat2, x2, w1, b1, w2, b2)
    for resident in (True, False):
        out2 = jax.block_until_ready(
            gcn_forward(a_hat2, x2, w1, b1, w2, b2,
                        allow_fused=False, tile_agg=512, feat_resident=resident))
        assert out2.shape == (N2, OUT_SIZE)
        assert jnp.allclose(out2, ref2, atol=2e-4, rtol=2e-4), \
            float(jnp.max(jnp.abs(out2 - ref2)))

    print("KERNEL_OK")
</pallas_src>

<mosaic_0001>
module attributes {stable_mosaic.version = 11 : i64} {
  func.func @_gcn_fused_kernel(%arg0: memref<128x128xf32, #tpu.memory_space<vmem>>, %arg1: memref<128x128xf32, #tpu.memory_space<vmem>>, %arg2: memref<128x128xf32, #tpu.memory_space<vmem>>, %arg3: memref<1x128xf32, #tpu.memory_space<vmem>>, %arg4: memref<128x128xf32, #tpu.memory_space<vmem>>, %arg5: memref<1x128xf32, #tpu.memory_space<vmem>>, %arg6: memref<128x128xf32, #tpu.memory_space<vmem>>) attributes {dimension_semantics = [], scalar_prefetch = 0 : i64, scratch_operands = 0 : i64, tpu.core_type = #tpu.core_type<tc>} {
    %c0 = arith.constant 0 : index
    %c0_0 = arith.constant 0 : index
    %0 = vector.load %arg0[%c0, %c0_0] : memref<128x128xf32, #tpu.memory_space<vmem>>, vector<128x128xf32>
    %c0_1 = arith.constant 0 : index
    %c0_2 = arith.constant 0 : index
    %1 = vector.load %arg1[%c0_1, %c0_2] : memref<128x128xf32, #tpu.memory_space<vmem>>, vector<128x128xf32>
    %c0_3 = arith.constant 0 : index
    %c0_4 = arith.constant 0 : index
    %2 = vector.load %arg2[%c0_3, %c0_4] : memref<128x128xf32, #tpu.memory_space<vmem>>, vector<128x128xf32>
    %cst = arith.constant dense<0.000000e+00> : vector<128x128xf32>
    %3 = tpu.matmul %1, %2, %cst {dimension_numbers = #tpu.dot_dimension_numbers<[1], [0], [0], [1], [0, 0, 1, 1], [], []>} : vector<128x128xf32>, vector<128x128xf32>, vector<128x128xf32> -> vector<128x128xf32>
    %cst_5 = arith.constant dense<0.000000e+00> : vector<128x128xf32>
    %4 = tpu.matmul %0, %3, %cst_5 {dimension_numbers = #tpu.dot_dimension_numbers<[1], [0], [0], [1], [0, 0, 1, 1], [], []>} : vector<128x128xf32>, vector<128x128xf32>, vector<128x128xf32> -> vector<128x128xf32>
    %c0_6 = arith.constant 0 : index
    %c0_7 = arith.constant 0 : index
    %5 = vector.load %arg3[%c0_6, %c0_7] : memref<1x128xf32, #tpu.memory_space<vmem>>, vector<1x128xf32>
    %6 = vector.broadcast %5 : vector<1x128xf32> to vector<128x128xf32>
    %7 = arith.addf %4, %6 : vector<128x128xf32>
    %cst_8 = arith.constant 0.000000e+00 : f32
    %8 = vector.broadcast %cst_8 : f32 to vector<128x128xf32>
    %9 = arith.maximumf %7, %8 : vector<128x128xf32>
    %c0_9 = arith.constant 0 : index
    %c0_10 = arith.constant 0 : index
    %10 = vector.load %arg4[%c0_9, %c0_10] : memref<128x128xf32, #tpu.memory_space<vmem>>, vector<128x128xf32>
    %cst_11 = arith.constant dense<0.000000e+00> : vector<128x128xf32>
    %11 = tpu.matmul %9, %10, %cst_11 {dimension_numbers = #tpu.dot_dimension_numbers<[1], [0], [0], [1], [0, 0, 1, 1], [], []>} : vector<128x128xf32>, vector<128x128xf32>, vector<128x128xf32> -> vector<128x128xf32>
    %cst_12 = arith.constant dense<0.000000e+00> : vector<128x128xf32>
    %12 = tpu.matmul %0, %11, %cst_12 {dimension_numbers = #tpu.dot_dimension_numbers<[1], [0], [0], [1], [0, 0, 1, 1], [], []>} : vector<128x128xf32>, vector<128x128xf32>, vector<128x128xf32> -> vector<128x128xf32>
    %c0_13 = arith.constant 0 : index
    %c0_14 = arith.constant 0 : index
    %13 = vector.load %arg5[%c0_13, %c0_14] : memref<1x128xf32, #tpu.memory_space<vmem>>, vector<1x128xf32>
    %14 = vector.broadcast %13 : vector<1x128xf32> to vector<128x128xf32>
    %15 = arith.addf %12, %14 : vector<128x128xf32>
    %16 = tpu.iota {dimensions = array<i32: 0>} : vector<128x128xi32>
    %c64_i32 = arith.constant 64 : i32
    %17 = vector.broadcast %c64_i32 : i32 to vector<128x128xi32>
    %18 = arith.cmpi slt, %16, %17 : vector<128x128xi32>
    %cst_15 = arith.constant 0.000000e+00 : f32
    %19 = vector.broadcast %cst_15 : f32 to vector<128x128xf32>
    %20 = arith.select %18, %15, %19 : vector<128x128xi1>, vector<128x128xf32>
    %21 = arith.mulf %20, %20 : vector<128x128xf32>
    %cst_16 = arith.constant dense<0.000000e+00> : vector<128xf32>
    %22 = vector.multi_reduction <add>, %21, %cst_16 [0] : vector<128x128xf32> to vector<128xf32>
    %23 = vector.shape_cast %22 : vector<128xf32> to vector<1x128xf32>
    %cst_17 = arith.constant 1.000000e-24 : f32
    %24 = vector.broadcast %cst_17 : f32 to vector<1x128xf32>
    %25 = arith.maximumf %23, %24 : vector<1x128xf32>
    %26 = math.rsqrt %25 : vector<1x128xf32>
    %27 = vector.broadcast %26 : vector<1x128xf32> to vector<128x128xf32>
    %28 = arith.mulf %15, %27 : vector<128x128xf32>
    %c0_18 = arith.constant 0 : index
    %c0_19 = arith.constant 0 : index
    %29 = vector.load %arg6[%c0_18, %c0_19] : memref<128x128xf32, #tpu.memory_space<vmem>>, vector<128x128xf32>
    tpu.vector_store %arg6[%c0_18, %c0_19], %28 {strides = array<i32>} : memref<128x128xf32, #tpu.memory_space<vmem>>, vector<128x128xf32>,
    return
  }
}

</mosaic_0001>

<bundles_post_ra>
// kernel: tpu_custom_call.1
= control target key start
LH: loop header
LB: loop body
LE: loop exit
PB: predicated region body
PF: predicated region fallthrough
CT: control target
= control target key end

     0   :  { %11 = vsyncpa [#allocation3], 0  ;;  %s884_s0 = inlined_call_operand.hbm [shape: f32[128,128], index: 0, kind: input, shape index: {}]   ;;  %s885_s1 = inlined_call_operand.hbm [shape: f32[128,128], index: 1, kind: input, shape index: {}]   ;;  %s886_s2 = inlined_call_operand.hbm [shape: f32[128,128], index: 2, kind: input, shape index: {}]   ;;  %s887_s3 = inlined_call_operand.vmem [shape: f32[1,128], index: 3, kind: input, shape index: {}]   ;;  %s888_s4 = inlined_call_operand.hbm [shape: f32[128,128], index: 4, kind: input, shape index: {}]   ;;  %s889_s5 = inlined_call_operand.vmem [shape: f32[1,128], index: 5, kind: input, shape index: {}]   ;;  %s890_s6 = inlined_call_operand.hbm [shape: f32[128,128], index: 6, kind: output, shape index: {}]  }
   0x1   :  { %12 = vsyncpa [#allocation6], 0 }
   0x2   :  { %13 = vsyncpa [#allocation9], 0 }
   0x3   :  { %14 = vsyncpa [#allocation4], 0  ;;  %s32_s23 = sshll.u32 %s885_s1, 4  ;;  %s724_s24 = smov [#allocation5]   ;;  %s33_s23 = int_to_ptr.hbm [resolvable:$true] %s32_s23 }
   0x4   :  { %s34_s25 = sshll.u32 %s724_s24, 4  ;;  %s19_s28 = sshll.u32 %s884_s0, 4  ;;  %s35_s25 = int_to_ptr.vmem [resolvable:$true] %s34_s25  ;;  %s20_s28 = int_to_ptr.hbm [resolvable:$true] %s19_s28 }
   0x5   :  { %s725_s29 = smov 128   ;;  %s726_s30 = smov 8  }
   0x6   :  { %40 = dma.hbm_to_vmem [thread:$0]  %s33_s23, 2048, %s35_s25, [#allocation6], %s725_s29, %s725_s29, %s726_s30  }
   0x7   :  { %s727_s7 = smov [#allocation2]   ;;  %s45_s1 = sshll.u32 %s886_s2, 4  ;;  %s46_s1 = int_to_ptr.hbm [resolvable:$true] %s45_s1 }
   0x8   :  { %s21_s8 = sshll.u32 %s727_s7, 4  ;;  %s60_s12 = sshll.u32 %s888_s4, 4  ;;  %s22_s8 = int_to_ptr.vmem [resolvable:$true] %s21_s8  ;;  %s61_s12 = int_to_ptr.hbm [resolvable:$true] %s60_s12 }
   0x9   :  { %27 = dma.hbm_to_vmem [thread:$0]  %s20_s28, 2048, %s22_s8, [#allocation3], %s725_s29, %s725_s29, %s726_s30  }
   0xa   :  { %s728_s13 = smov [#allocation7]   ;;  %s729_s15 = smov [#allocation8]  }
   0xb   :  { %s47_s14 = sshll.u32 %s728_s13, 4  ;;  %s62_s2 = sshll.u32 %s729_s15, 4  ;;  %s48_s14 = int_to_ptr.vmem [resolvable:$true] %s47_s14  ;;  %s63_s2 = int_to_ptr.vmem [resolvable:$true] %s62_s2 }
   0xc   :  { %53 = dma.hbm_to_vmem [thread:$0]  %s46_s1, 2048, %s48_s14, [#allocation6], %s725_s29, %s725_s29, %s726_s30  }
   0xd   :  { %68 = dma.hbm_to_vmem [thread:$0]  %s61_s12, 2048, %s63_s2, [#allocation9], %s725_s29, %s725_s29, %s726_s30  }
   0xe   :  { %716 = dma.done.wait [#allocation3], 2048  }
   0xf   :  { %717 = vsyncadd [#allocation3], 4294965248 }
  0x10   :  { %718 = dma.done.wait [#allocation6], 4096  }
  0x11   :  { %719 = vsyncadd [#allocation6], 4294963200 }
  0x12   :  { %720 = dma.done.wait [#allocation9], 2048  }
  0x13   :  { %721 = vsyncadd [#allocation9], 4294965248  ;;  %v134_v0 = vld [vmem:[#allocation7 + $0x78] sm:$0xff]  ;;  %v133_v1 = vld [vmem:[#allocation7 + $0x70] sm:$0xff]  ;;  %s570_s21 = sshll.u32 %s890_s6, 4  ;;  %s571_s21 = int_to_ptr.hbm [resolvable:$true] %s570_s21 }
  0x14   :  { %135 = vmatpush.msra.mxu0 %v134_v0  ;;  %v132_v2 = vld [vmem:[#allocation7 + $0x68] sm:$0xff]  ;;  %v131_v3 = vld [vmem:[#allocation7 + $0x60] sm:$0xff]  ;;  %v130_v4 = vld [vmem:[#allocation7 + $0x58] sm:$0xff] }
  0x15   :  { %v129_v5 = vld [vmem:[#allocation7 + $0x50] sm:$0xff]  ;;  %v128_v6 = vld [vmem:[#allocation7 + $0x48] sm:$0xff]  ;;  %v127_v7 = vld [vmem:[#allocation7 + $0x40] sm:$0xff] }
  0x16   :  { %136 = vmatpush.msra.mxu0 %v133_v1  ;;  %v126_v8 = vld [vmem:[#allocation7 + $0x38] sm:$0xff]  ;;  %v125_v9 = vld [vmem:[#allocation7 + $0x30] sm:$0xff]  ;;  %v124_v10 = vld [vmem:[#allocation7 + $0x28] sm:$0xff] }
  0x17   :  { %v123_v11 = vld [vmem:[#allocation7 + $0x20] sm:$0xff]  ;;  %v122_v12 = vld [vmem:[#allocation7 + $0x18] sm:$0xff]  ;;  %v121_v13 = vld [vmem:[#allocation7 + $0x10] sm:$0xff] }
  0x18   :  { %137 = vmatpush.msra.mxu0 %v132_v2  ;;  %v120_v14 = vld [vmem:[#allocation7 + $0x8] sm:$0xff]  ;;  %v119_v15 = vld [vmem:[#allocation7] sm:$0xff]  ;;  %v105_v18 = vld [vmem:[#allocation5 + $0x10] sm:$0xff] }
  0x19   :  { %v103_v16 = vld [vmem:[#allocation5] sm:$0xff]  ;;  %v104_v17 = vld [vmem:[#allocation5 + $0x8] sm:$0xff]  ;;  %v106_v19 = vld [vmem:[#allocation5 + $0x18] sm:$0xff] }
  0x1a   :  { %138 = vmatpush.msra.mxu0 %v131_v3  ;;  %v107_v20 = vld [vmem:[#allocation5 + $0x20] sm:$0xff]  ;;  %v108_v21 = vld [vmem:[#allocation5 + $0x28] sm:$0xff]  ;;  %v109_v22 = vld [vmem:[#allocation5 + $0x30] sm:$0xff] }
  0x1b   :  { %v110_v23 = vld [vmem:[#allocation5 + $0x38] sm:$0xff]  ;;  %v111_v24 = vld [vmem:[#allocation5 + $0x40] sm:$0xff]  ;;  %v112_v25 = vld [vmem:[#allocation5 + $0x48] sm:$0xff] }
  0x1c   :  { %139 = vmatpush.msra.mxu0 %v130_v4  ;;  %v113_v26 = vld [vmem:[#allocation5 + $0x50] sm:$0xff]  ;;  %v114_v27 = vld [vmem:[#allocation5 + $0x58] sm:$0xff]  ;;  %v115_v28 = vld [vmem:[#allocation5 + $0x60] sm:$0xff] }
  0x1d   :  { %v116_v29 = vld [vmem:[#allocation5 + $0x68] sm:$0xff]  ;;  %v117_v30 = vld [vmem:[#allocation5 + $0x70] sm:$0xff]  ;;  %v118_v31 = vld [vmem:[#allocation5 + $0x78] sm:$0xff] }
  0x1e   :  { %140 = vmatpush.msra.mxu0 %v129_v5  ;;  %v790_v48 = vld [vmem:[#allocation2] sm:$0xff]  ;;  %v793_v49 = vld [vmem:[#allocation2 + $0x8] sm:$0xff]  ;;  %v796_v50 = vld [vmem:[#allocation2 + $0x10] sm:$0xff] }
  0x1f   :  { %v799_v51 = vld [vmem:[#allocation2 + $0x18] sm:$0xff]  ;;  %v802_v52 = vld [vmem:[#allocation2 + $0x20] sm:$0xff]  ;;  %v805_v53 = vld [vmem:[#allocation2 + $0x28] sm:$0xff] }
  0x20   :  { %141 = vmatpush.msra.mxu0 %v128_v6  ;;  %v808_v54 = vld [vmem:[#allocation2 + $0x30] sm:$0xff]  ;;  %v811_v55 = vld [vmem:[#allocation2 + $0x38] sm:$0xff]  ;;  %v814_v56 = vld [vmem:[#allocation2 + $0x40] sm:$0xff] }
  0x21   :  { %v300_v57 = vld [vmem:[#allocation8 + $0x78] sm:$0xff]  ;;  %v299_v58 = vld [vmem:[#allocation8 + $0x70] sm:$0xff]  ;;  %v298_v59 = vld [vmem:[#allocation8 + $0x68] sm:$0xff] }
  0x22   :  { %142 = vmatpush.msra.mxu0 %v127_v7  ;;  %301 = vmatpush.msra.mxu2 %v300_v57  ;;  %v817_v60 = vld [vmem:[#allocation2 + $0x48] sm:$0xff]  ;;  %v297_v61 = vld [vmem:[#allocation8 + $0x60] sm:$0xff]  ;;  %v296_v62 = vld [vmem:[#allocation8 + $0x58] sm:$0xff] }
  0x23   :  { %v295_v63 = vld [vmem:[#allocation8 + $0x50] sm:$0xff]  ;;  %v294_v0 = vld [vmem:[#allocation8 + $0x48] sm:$0xff]  ;;  %v293_v2 = vld [vmem:[#allocation8 + $0x40] sm:$0xff] }
  0x24   :  { %143 = vmatpush.msra.mxu0 %v126_v8  ;;  %302 = vmatpush.msra.mxu2 %v299_v58  ;;  %v820_v1 = vld [vmem:[#allocation2 + $0x50] sm:$0xff]  ;;  %v292_v3 = vld [vmem:[#allocation8 + $0x38] sm:$0xff]  ;;  %v290_v5 = vld [vmem:[#allocation8 + $0x28] sm:$0xff] }
  0x25   :  { %v291_v4 = vld [vmem:[#allocation8 + $0x30] sm:$0xff]  ;;  %v823_v6 = vld [vmem:[#allocation2 + $0x58] sm:$0xff]  ;;  %v289_v7 = vld [vmem:[#allocation8 + $0x20] sm:$0xff] }
  0x26   :  { %144 = vmatpush.msra.mxu0 %v125_v9  ;;  %303 = vmatpush.msra.mxu2 %v298_v59  ;;  %v288_v8 = vld [vmem:[#allocation8 + $0x18] sm:$0xff]  ;;  %v287_v9 = vld [vmem:[#allocation8 + $0x10] sm:$0xff] }
  0x28   :  { %145 = vmatpush.msra.mxu0 %v124_v10  ;;  %304 = vmatpush.msra.mxu2 %v297_v61  ;;  %v826_v10 = vld [vmem:[#allocation2 + $0x60] sm:$0xff] }
  0x2a   :  { %146 = vmatpush.msra.mxu0 %v123_v11  ;;  %305 = vmatpush.msra.mxu2 %v296_v62  ;;  %v286_v11 = vld [vmem:[#allocation8 + $0x8] sm:$0xff] }
  0x2c   :  { %147 = vmatpush.msra.mxu0 %v122_v12  ;;  %306 = vmatpush.msra.mxu2 %v295_v63  ;;  %v285_v12 = vld [vmem:[#allocation8] sm:$0xff] }
  0x2e   :  { %148 = vmatpush.msra.mxu0 %v121_v13  ;;  %307 = vmatpush.msra.mxu2 %v294_v0  ;;  %v829_v13 = vld [vmem:[#allocation2 + $0x68] sm:$0xff] }
  0x30   :  { %149 = vmatpush.msra.mxu0 %v120_v14  ;;  %308 = vmatpush.msra.mxu2 %v293_v2  ;;  %v832_v14 = vld [vmem:[#allocation2 + $0x70] sm:$0xff] }
  0x32   :  { %150 = vmatpush.msra.mxu0 %v119_v15  ;;  %309 = vmatpush.msra.mxu2 %v292_v3  ;;  %v835_v15 = vld [vmem:[#allocation2 + $0x78] sm:$0xff] }
  0x33   :  { %151 = vmatmul.f32.vlgmr.msra.gmra.mxu0 %v103_v16  ;;  %v592_v16 = vld [vmem:[%s887_s3] ss:$0 sm:$0xff] }
  0x34   :  { %310 = vmatpush.msra.mxu2 %v291_v4 }
  0x36   :  { %311 = vmatpush.msra.mxu2 %v290_v5 }
  0x38   :  { %312 = vmatpush.msra.mxu2 %v289_v7 }
  0x3a   :  { %313 = vmatpush.msra.mxu2 %v288_v8 }
  0x3b   :  { %154 = vmatmul.f32.gmra.mxu0 %v104_v17 }
  0x3c   :  { %314 = vmatpush.msra.mxu2 %v287_v9 }
  0x3e   :  { %315 = vmatpush.msra.mxu2 %v286_v11 }
  0x40   :  { %316 = vmatpush.msra.mxu2 %v285_v12 }
  0x43   :  { %157 = vmatmul.f32.gmra.mxu0 %v105_v18 }
  0x4b   :  { %160 = vmatmul.f32.gmra.mxu0 %v106_v19 }
  0x53   :  { %163 = vmatmul.f32.gmra.mxu0 %v107_v20 }
  0x5b   :  { %166 = vmatmul.f32.gmra.mxu0 %v108_v21 }
  0x63   :  { %169 = vmatmul.f32.gmra.mxu0 %v109_v22 }
  0x6b   :  { %172 = vmatmul.f32.gmra.mxu0 %v110_v23 }
  0x73   :  { %175 = vmatmul.f32.gmra.mxu0 %v111_v24 }
  0x7b   :  { %178 = vmatmul.f32.gmra.mxu0 %v112_v25 }
  0x83   :  { %181 = vmatmul.f32.gmra.mxu0 %v113_v26 }
  0x8b   :  { %184 = vmatmul.f32.gmra.mxu0 %v114_v27 }
  0x93   :  { %187 = vmatmul.f32.gmra.mxu0 %v115_v28 }
  0x9b   :  { %190 = vmatmul.f32.gmra.mxu0 %v116_v29 }
  0xa3   :  { %193 = vmatmul.f32.gmra.mxu0 %v117_v30 }
  0xab   :  { %196 = vmatmul.f32.gmra.mxu0 %v118_v31 }
  0xb0   :  { %v152_v32 = vpop.f32.mrf.mxu0 }
  0xb8   :  { %v155_v33 = vpop.f32.mrf.mxu0 }
  0xc0   :  { %v158_v34 = vpop.f32.mrf.mxu0 }
  0xc8   :  { %v161_v35 = vpop.f32.mrf.mxu0 }
  0xd0   :  { %v164_v36 = vpop.f32.mrf.mxu0 }
  0xd8   :  { %v167_v37 = vpop.f32.mrf.mxu0 }
  0xe0   :  { %v170_v38 = vpop.f32.mrf.mxu0 }
  0xe8   :  { %v173_v39 = vpop.f32.mrf.mxu0 }
  0xf0   :  { %v176_v40 = vpop.f32.mrf.mxu0 }
  0xf8   :  { %v179_v41 = vpop.f32.mrf.mxu0 }
 0x100   :  { %v182_v42 = vpop.f32.mrf.mxu0 }
 0x108   :  { %v185_v43 = vpop.f32.mrf.mxu0 }
 0x110   :  { %v188_v44 = vpop.f32.mrf.mxu0 }
 0x118   :  { %v191_v45 = vpop.f32.mrf.mxu0 }
 0x120   :  { %v194_v46 = vpop.f32.mrf.mxu0 }
 0x128   :  { %v197_v47 = vpop.f32.mrf.mxu0 }
 0x129   :  { %204 = vmatpush.msra.mxu1 %v197_v47 }
 0x12b   :  { %205 = vmatpush.msra.mxu1 %v194_v46 }
 0x12d   :  { %206 = vmatpush.msra.mxu1 %v191_v45 }
 0x12f   :  { %207 = vmatpush.msra.mxu1 %v188_v44 }
 0x131   :  { %208 = vmatpush.msra.mxu1 %v185_v43 }
 0x133   :  { %209 = vmatpush.msra.mxu1 %v182_v42 }
 0x135   :  { %210 = vmatpush.msra.mxu1 %v179_v41 }
 0x137   :  { %211 = vmatpush.msra.mxu1 %v176_v40 }
 0x139   :  { %212 = vmatpush.msra.mxu1 %v173_v39 }
 0x13b   :  { %213 = vmatpush.msra.mxu1 %v170_v38 }
 0x13d   :  { %214 = vmatpush.msra.mxu1 %v167_v37 }
 0x13f   :  { %215 = vmatpush.msra.mxu1 %v164_v36 }
 0x141   :  { %216 = vmatpush.msra.mxu1 %v161_v35 }
 0x143   :  { %217 = vmatpush.msra.mxu1 %v158_v34 }
 0x145   :  { %218 = vmatpush.msra.mxu1 %v155_v33 }
 0x147   :  { %219 = vmatpush.msra.mxu1 %v152_v32 }
 0x148   :  { %220 = vmatmul.f32.vlgmr.msra.gmra.mxu1 %v790_v48 }
 0x150   :  { %223 = vmatmul.f32.gmra.mxu1 %v793_v49 }
 0x158   :  { %226 = vmatmul.f32.gmra.mxu1 %v796_v50 }
 0x160   :  { %229 = vmatmul.f32.gmra.mxu1 %v799_v51 }
 0x168   :  { %232 = vmatmul.f32.gmra.mxu1 %v802_v52 }
 0x170   :  { %235 = vmatmul.f32.gmra.mxu1 %v805_v53 }
 0x178   :  { %238 = vmatmul.f32.gmra.mxu1 %v808_v54 }
 0x180   :  { %241 = vmatmul.f32.gmra.mxu1 %v811_v55 }
 0x188   :  { %244 = vmatmul.f32.gmra.mxu1 %v814_v56 }
 0x190   :  { %247 = vmatmul.f32.gmra.mxu1 %v817_v60 }
 0x198   :  { %250 = vmatmul.f32.gmra.mxu1 %v820_v1 }
 0x1a0   :  { %253 = vmatmul.f32.gmra.mxu1 %v823_v6 }
 0x1a8   :  { %256 = vmatmul.f32.gmra.mxu1 %v826_v10 }
 0x1b0   :  { %259 = vmatmul.f32.gmra.mxu1 %v829_v13 }
 0x1b8   :  { %262 = vmatmul.f32.gmra.mxu1 %v832_v14 }
 0x1c0   :  { %265 = vmatmul.f32.gmra.mxu1 %v835_v15 }
 0x1c5   :  { %v221_v17 = vpop.f32.mrf.mxu1 }
 0x1c6   :  { %v222_v18 = vadd.f32 %v592_v16, %v221_v17 }
 0x1c8   :  { %v269_v19 = vmax.f32 %v222_v18, 0.0 }
 0x1ca   :  { %317 = vmatmul.f32.vlgmr.msra.gmra.mxu2 %v269_v19 }
 0x1cd   :  { %v224_v20 = vpop.f32.mrf.mxu1 }
 0x1ce   :  { %v225_v21 = vadd.f32 %v592_v16, %v224_v20 }
 0x1d0   :  { %v270_v22 = vmax.f32 %v225_v21, 0.0 }
 0x1d2   :  { %320 = vmatmul.f32.gmra.mxu2 %v270_v22 }
 0x1d5   :  { %v227_v23 = vpop.f32.mrf.mxu1 }
 0x1d6   :  { %v228_v24 = vadd.f32 %v592_v16, %v227_v23 }
 0x1d8   :  { %v271_v25 = vmax.f32 %v228_v24, 0.0 }
 0x1da   :  { %323 = vmatmul.f32.gmra.mxu2 %v271_v25 }
 0x1dd   :  { %v230_v26 = vpop.f32.mrf.mxu1 }
 0x1de   :  { %v231_v27 = vadd.f32 %v592_v16, %v230_v26 }
 0x1e0   :  { %v272_v28 = vmax.f32 %v231_v27, 0.0 }
 0x1e2   :  { %326 = vmatmul.f32.gmra.mxu2 %v272_v28 }
 0x1e5   :  { %v233_v29 = vpop.f32.mrf.mxu1 }
 0x1e6   :  { %v234_v30 = vadd.f32 %v592_v16, %v233_v29 }
 0x1e8   :  { %v273_v31 = vmax.f32 %v234_v30, 0.0 }
 0x1ea   :  { %329 = vmatmul.f32.gmra.mxu2 %v273_v31 }
 0x1ed   :  { %v236_v32 = vpop.f32.mrf.mxu1 }
 0x1ee   :  { %v237_v33 = vadd.f32 %v592_v16, %v236_v32 }
 0x1f0   :  { %v274_v34 = vmax.f32 %v237_v33, 0.0 }
 0x1f2   :  { %332 = vmatmul.f32.gmra.mxu2 %v274_v34 }
 0x1f5   :  { %v239_v35 = vpop.f32.mrf.mxu1 }
 0x1f6   :  { %v240_v36 = vadd.f32 %v592_v16, %v239_v35 }
 0x1f8   :  { %v275_v37 = vmax.f32 %v240_v36, 0.0 }
 0x1fa   :  { %335 = vmatmul.f32.gmra.mxu2 %v275_v37 }
 0x1fd   :  { %v242_v38 = vpop.f32.mrf.mxu1 }
 0x1fe   :  { %v243_v39 = vadd.f32 %v592_v16, %v242_v38 }
 0x200   :  { %v276_v40 = vmax.f32 %v243_v39, 0.0 }
 0x202   :  { %338 = vmatmul.f32.gmra.mxu2 %v276_v40 }
 0x205   :  { %v245_v41 = vpop.f32.mrf.mxu1 }
 0x206   :  { %v246_v42 = vadd.f32 %v592_v16, %v245_v41 }
 0x208   :  { %v277_v43 = vmax.f32 %v246_v42, 0.0 }
 0x20a   :  { %341 = vmatmul.f32.gmra.mxu2 %v277_v43 }
 0x20d   :  { %v248_v44 = vpop.f32.mrf.mxu1 }
 0x20e   :  { %v249_v45 = vadd.f32 %v592_v16, %v248_v44 }
 0x210   :  { %v278_v46 = vmax.f32 %v249_v45, 0.0 }
 0x212   :  { %344 = vmatmul.f32.gmra.mxu2 %v278_v46 }
 0x215   :  { %v251_v47 = vpop.f32.mrf.mxu1 }
 0x216   :  { %v252_v57 = vadd.f32 %v592_v16, %v251_v47 }
 0x218   :  { %v279_v58 = vmax.f32 %v252_v57, 0.0 }
 0x21a   :  { %347 = vmatmul.f32.gmra.mxu2 %v279_v58 }
 0x21d   :  { %v254_v59 = vpop.f32.mrf.mxu1 }
 0x21e   :  { %v255_v61 = vadd.f32 %v592_v16, %v254_v59 }
 0x220   :  { %v280_v62 = vmax.f32 %v255_v61, 0.0 }
 0x222   :  { %350 = vmatmul.f32.gmra.mxu2 %v280_v62 }
 0x225   :  { %v257_v63 = vpop.f32.mrf.mxu1 }
 0x226   :  { %v258_v0 = vadd.f32 %v592_v16, %v257_v63 }
 0x228   :  { %v281_v2 = vmax.f32 %v258_v0, 0.0 }
 0x22a   :  { %353 = vmatmul.f32.gmra.mxu2 %v281_v2 }
 0x22d   :  { %v260_v3 = vpop.f32.mrf.mxu1 }
 0x22e   :  { %v261_v4 = vadd.f32 %v592_v16, %v260_v3 }
 0x230   :  { %v282_v5 = vmax.f32 %v261_v4, 0.0 }
 0x232   :  { %356 = vmatmul.f32.gmra.mxu2 %v282_v5 }
 0x235   :  { %v263_v7 = vpop.f32.mrf.mxu1 }
 0x236   :  { %v264_v8 = vadd.f32 %v592_v16, %v263_v7 }
 0x238   :  { %v283_v9 = vmax.f32 %v264_v8, 0.0 }
 0x23a   :  { %359 = vmatmul.f32.gmra.mxu2 %v283_v9 }
 0x23d   :  { %v266_v11 = vpop.f32.mrf.mxu1 }
 0x23e   :  { %v267_v12 = vadd.f32 %v592_v16, %v266_v11 }
 0x240   :  { %v284_v17 = vmax.f32 %v267_v12, 0.0 }
 0x242   :  { %362 = vmatmul.f32.gmra.mxu2 %v284_v17 }
 0x24d   :  { %v318_v18 = vpop.f32.mrf.mxu2 }
 0x255   :  { %v321_v19 = vpop.f32.mrf.mxu2 }
 0x25d   :  { %v324_v20 = vpop.f32.mrf.mxu2 }
 0x265   :  { %v327_v21 = vpop.f32.mrf.mxu2 }
 0x26d   :  { %v330_v22 = vpop.f32.mrf.mxu2 }
 0x275   :  { %v333_v23 = vpop.f32.mrf.mxu2 }
 0x27d   :  { %v336_v24 = vpop.f32.mrf.mxu2 }
 0x285   :  { %v339_v25 = vpop.f32.mrf.mxu2 }
 0x28d   :  { %v342_v26 = vpop.f32.mrf.mxu2 }
 0x295   :  { %v345_v27 = vpop.f32.mrf.mxu2 }
 0x29d   :  { %v348_v28 = vpop.f32.mrf.mxu2 }
 0x2a5   :  { %v351_v29 = vpop.f32.mrf.mxu2 }
 0x2ad   :  { %v354_v30 = vpop.f32.mrf.mxu2 }
 0x2b5   :  { %v357_v31 = vpop.f32.mrf.mxu2 }
 0x2bd   :  { %v360_v32 = vpop.f32.mrf.mxu2 }
 0x2c5   :  { %v363_v33 = vpop.f32.mrf.mxu2 }
 0x2c6   :  { %370 = vmatpush.msra.mxu3 %v363_v33 }
 0x2c8   :  { %371 = vmatpush.msra.mxu3 %v360_v32 }
 0x2ca   :  { %372 = vmatpush.msra.mxu3 %v357_v31 }
 0x2cc   :  { %373 = vmatpush.msra.mxu3 %v354_v30 }
 0x2ce   :  { %374 = vmatpush.msra.mxu3 %v351_v29 }
 0x2d0   :  { %375 = vmatpush.msra.mxu3 %v348_v28 }
 0x2d2   :  { %376 = vmatpush.msra.mxu3 %v345_v27 }
 0x2d4   :  { %377 = vmatpush.msra.mxu3 %v342_v26 }
 0x2d6   :  { %378 = vmatpush.msra.mxu3 %v339_v25 }
 0x2d8   :  { %379 = vmatpush.msra.mxu3 %v336_v24 }
 0x2da   :  { %380 = vmatpush.msra.mxu3 %v333_v23 }
 0x2dc   :  { %381 = vmatpush.msra.mxu3 %v330_v22 }
 0x2de   :  { %382 = vmatpush.msra.mxu3 %v327_v21 }
 0x2e0   :  { %383 = vmatpush.msra.mxu3 %v324_v20 }
 0x2e2   :  { %384 = vmatpush.msra.mxu3 %v321_v19 }
 0x2e4   :  { %385 = vmatpush.msra.mxu3 %v318_v18 }
 0x2e5   :  { %386 = vmatmul.f32.vlgmr.msra.gmra.mxu3 %v790_v48 }
 0x2ed   :  { %389 = vmatmul.f32.gmra.mxu3 %v793_v49 }
 0x2f5   :  { %392 = vmatmul.f32.gmra.mxu3 %v796_v50 }
 0x2fd   :  { %395 = vmatmul.f32.gmra.mxu3 %v799_v51 }
 0x305   :  { %398 = vmatmul.f32.gmra.mxu3 %v802_v52 }
 0x30d   :  { %401 = vmatmul.f32.gmra.mxu3 %v805_v53  ;;  %v860_v53 = vld [vmem:[%s889_s5] ss:$0 sm:$0xff]  ;;  %s730_s5 = smov [#allocation10]  }
 0x30e   :  { %s568_s18 = sshll.u32 %s730_s5, 4  ;;  %s569_s18 = int_to_ptr.vmem [resolvable:$true] %s568_s18 }
 0x315   :  { %404 = vmatmul.f32.gmra.mxu3 %v808_v54 }
 0x31d   :  { %407 = vmatmul.f32.gmra.mxu3 %v811_v55 }
 0x325   :  { %410 = vmatmul.f32.gmra.mxu3 %v814_v56 }
 0x32d   :  { %413 = vmatmul.f32.gmra.mxu3 %v817_v60 }
 0x335   :  { %416 = vmatmul.f32.gmra.mxu3 %v820_v1 }
 0x33d   :  { %419 = vmatmul.f32.gmra.mxu3 %v823_v6 }
 0x345   :  { %422 = vmatmul.f32.gmra.mxu3 %v826_v10 }
 0x34d   :  { %425 = vmatmul.f32.gmra.mxu3 %v829_v13 }
 0x355   :  { %428 = vmatmul.f32.gmra.mxu3 %v832_v14 }
 0x35d   :  { %431 = vmatmul.f32.gmra.mxu3 %v835_v15 }
 0x368   :  { %v387_v48 = vpop.f32.mrf.mxu3 }
 0x369   :  { %v388_v56 = vadd.f32 %v860_v53, %v387_v48 }
 0x36b   :  { %v484_v10 = vmul.f32 %v388_v56, %v388_v56 }
 0x370   :  { %v390_v49 = vpop.f32.mrf.mxu3 }
 0x371   :  { %v391_v55 = vadd.f32 %v860_v53, %v390_v49 }
 0x373   :  { %v485_v1 = vmul.f32 %v391_v55, %v391_v55 }
 0x375   :  { %v500_v16 = vadd.f32 %v485_v1, %v484_v10 }
 0x378   :  { %v393_v50 = vpop.f32.mrf.mxu3 }
 0x379   :  { %v394_v60 = vadd.f32 %v860_v53, %v393_v50 }
 0x37b   :  { %v486_v13 = vmul.f32 %v394_v60, %v394_v60 }
 0x37d   :  { %v501_v36 = vadd.f32 %v500_v16, %v486_v13 }
 0x380   :  { %v396_v51 = vpop.f32.mrf.mxu3 }
 0x381   :  { %v397_v6 = vadd.f32 %v860_v53, %v396_v51 }
 0x383   :  { %v487_v34 = vmul.f32 %v397_v6, %v397_v6 }
 0x385   :  { %v502_v39 = vadd.f32 %v501_v36, %v487_v34 }
 0x388   :  { %v399_v52 = vpop.f32.mrf.mxu3 }
 0x389   :  { %v400_v14 = vadd.f32 %v860_v53, %v399_v52 }
 0x38b   :  { %v488_v37 = vmul.f32 %v400_v14, %v400_v14 }
 0x38d   :  { %v503_v41 = vadd.f32 %v502_v39, %v488_v37 }
 0x390   :  { %v402_v54 = vpop.f32.mrf.mxu3 }
 0x391   :  { %v403_v35 = vadd.f32 %v860_v53, %v402_v54 }
 0x393   :  { %v489_v40 = vmul.f32 %v403_v35, %v403_v35 }
 0x395   :  { %v504_v44 = vadd.f32 %v503_v41, %v489_v40 }
 0x398   :  { %v405_v15 = vpop.f32.mrf.mxu3 }
 0x399   :  { %v406_v38 = vadd.f32 %v860_v53, %v405_v15 }
 0x39b   :  { %v490_v42 = vmul.f32 %v406_v38, %v406_v38 }
 0x39d   :  { %v505_v46 = vadd.f32 %v504_v44, %v490_v42 }
 0x3a0   :  { %v408_v43 = vpop.f32.mrf.mxu3 }
 0x3a1   :  { %v409_v45 = vadd.f32 %v860_v53, %v408_v43 }
 0x3a3   :  { %v491_v47 = vmul.f32 %v409_v45, %v409_v45 }
 0x3a5   :  { %v506_v57 = vadd.f32 %v505_v46, %v491_v47 }
 0x3a7   :  { %v515_v58 = vrot.slane %v506_v57, 4 }
 0x3a8   :  { %v411_v59 = vpop.f32.mrf.mxu3 }
 0x3a9   :  { %v516_v61 = vadd.f32 %v515_v58, %v506_v57  ;;  %v412_v28 = vadd.f32 %v860_v53, %v411_v59 }
 0x3ab   :  { %v517_v62 = vrot.slane %v516_v61, 2 }
 0x3ad   :  { %v518_v63 = vadd.f32 %v517_v62, %v516_v61 }
 0x3af   :  { %v519_v0 = vrot.slane %v518_v63, 1 }
 0x3b0   :  { %v414_v2 = vpop.f32.mrf.mxu3 }
 0x3b1   :  { %v520_v3 = vadd.f32 %v519_v0, %v518_v63  ;;  %v415_v30 = vadd.f32 %v860_v53, %v414_v2 }
 0x3b3   :  { %v521_v4 = vmax.f32 %v520_v3, 1e-24 }
 0x3b5   :  { %594 = vrsqrt.f32 %v521_v4  ;;  %vm528_vm1 = vweird.f32 %v521_v4 }
 0x3b8   :  { %v417_v5 = vpop.f32.mrf.mxu3 }
 0x3b9   :  { %v418_v32 = vadd.f32 %v860_v53, %v417_v5 }
 0x3bb   :  { %v595_v7 = vpop.eup %594 }
 0x3bc   :  { %v523_v8 = vmul.f32 %v595_v7, %v521_v4  ;;  %vm529_vm0 = vweird.f32 %v595_v7 }
 0x3bd   :  { %vm530_vm2 = vmor %vm528_vm1, %vm529_vm0 }
 0x3be   :  { %v524_v9 = vmul.f32 %v595_v7, %v523_v8 }
 0x3c0   :  { %v525_v11 = vmul.f32 0.5, %v524_v9  ;;  %v420_v12 = vpop.f32.mrf.mxu3 }
 0x3c1   :  { %v421_v49 = vadd.f32 %v860_v53, %v420_v12 }
 0x3c2   :  { %v526_v17 = vsub.f32 1.5, %v525_v11 }
 0x3c4   :  { %v527_v18 = vmul.f32 %v595_v7, %v526_v17 }
 0x3c6   :  { %v531_v19 = vsel %vm530_vm2, %v595_v7, %v527_v18 }
 0x3c7   :  { %v532_v20 = vmul.f32 %v531_v19, %v388_v56  ;;  %v533_v21 = vmul.f32 %v531_v19, %v391_v55  ;;  %v534_v22 = vmul.f32 %v531_v19, %v394_v60  ;;  %v535_v23 = vmul.f32 %v531_v19, %v397_v6 }
 0x3c8   :  { %v423_v24 = vpop.f32.mrf.mxu3  ;;  %v536_v25 = vmul.f32 %v531_v19, %v400_v14  ;;  %v537_v26 = vmul.f32 %v531_v19, %v403_v35  ;;  %v538_v27 = vmul.f32 %v531_v19, %v406_v38  ;;  %v539_v29 = vmul.f32 %v531_v19, %v409_v45 }
 0x3c9   :  { %548 = vst [vmem:[#allocation10] sm:$0xff] %v532_v20  ;;  %v540_v31 = vmul.f32 %v531_v19, %v412_v28  ;;  %v424_v33 = vadd.f32 %v860_v53, %v423_v24  ;;  %v541_v48 = vmul.f32 %v531_v19, %v415_v30  ;;  %v542_v50 = vmul.f32 %v531_v19, %v418_v32 }
 0x3ca   :  { %549 = vst [vmem:[#allocation10 + $0x8] sm:$0xff] %v533_v21  ;;  %v543_v51 = vmul.f32 %v531_v19, %v421_v49 }
 0x3cb   :  { %550 = vst [vmem:[#allocation10 + $0x10] sm:$0xff] %v534_v22  ;;  %v544_v54 = vmul.f32 %v531_v19, %v424_v33 }
 0x3cc   :  { %551 = vst [vmem:[#allocation10 + $0x18] sm:$0xff] %v535_v23 }
 0x3cd   :  { %552 = vst [vmem:[#allocation10 + $0x20] sm:$0xff] %v536_v25 }
 0x3ce   :  { %553 = vst [vmem:[#allocation10 + $0x28] sm:$0xff] %v537_v26 }
 0x3cf   :  { %554 = vst [vmem:[#allocation10 + $0x30] sm:$0xff] %v538_v27 }
 0x3d0   :  { %555 = vst [vmem:[#allocation10 + $0x38] sm:$0xff] %v539_v29  ;;  %v426_v52 = vpop.f32.mrf.mxu3 }
 0x3d1   :  { %556 = vst [vmem:[#allocation10 + $0x40] sm:$0xff] %v540_v31  ;;  %v427_v55 = vadd.f32 %v860_v53, %v426_v52 }
 0x3d2   :  { %557 = vst [vmem:[#allocation10 + $0x48] sm:$0xff] %v541_v48 }
 0x3d3   :  { %558 = vst [vmem:[#allocation10 + $0x50] sm:$0xff] %v542_v50  ;;  %v545_v56 = vmul.f32 %v531_v19, %v427_v55 }
 0x3d4   :  { %559 = vst [vmem:[#allocation10 + $0x58] sm:$0xff] %v543_v51 }
 0x3d5   :  { %560 = vst [vmem:[#allocation10 + $0x60] sm:$0xff] %v544_v54 }
 0x3d6   :  { %561 = vst [vmem:[#allocation10 + $0x68] sm:$0xff] %v545_v56 }
 0x3d8   :  { %v429_v60 = vpop.f32.mrf.mxu3 }
 0x3d9   :  { %v430_v1 = vadd.f32 %v860_v53, %v429_v60 }
 0x3db   :  { %v546_v6 = vmul.f32 %v531_v19, %v430_v1 }
 0x3dd   :  { %562 = vst [vmem:[#allocation10 + $0x70] sm:$0xff] %v546_v6 }
 0x3e0   :  { %v432_v10 = vpop.f32.mrf.mxu3 }
 0x3e1   :  { %v433_v13 = vadd.f32 %v860_v53, %v432_v10 }
 0x3e3   :  { %v547_v14 = vmul.f32 %v531_v19, %v433_v13 }
 0x3e5   :  { %563 = vst [vmem:[#allocation10 + $0x78] sm:$0xff] %v547_v14 }
 0x3e6   :  { %576 = dma.vmem_to_hbm [thread:$0]  %s569_s18, 2048, %s571_s21, [#allocation4], %s725_s29, %s725_s29, %s726_s30  }
 0x3e7   :  { %722 = dma.done.wait [#allocation4], 2048  }
 0x3e8   :  { %723 = vsyncadd [#allocation4], 4294965248 }
 0x3e9   :  { %581 = vsyncpa [#allocation3], 1 }
 0x3ea   :  { %582 = vsyncpa [#allocation6], 1 }
 0x3eb   :  { %583 = vsyncpa [#allocation9], 1 }
 0x3ec   :  { %584 = vsyncpa [#allocation4], 1 }

</bundles_post_ra>
